<compile_context>
chip_gen: v5e
topology: v5e:2x2
jax: 0.10.0
libtpu: 0.0.40
codegen_flags: <defaults>
</compile_context>

<pallas_src>
import functools

import jax
import jax.numpy as jnp
from jax import lax
from jax.experimental import pallas as pl
from jax.experimental.pallas import tpu as pltpu

_EPS = 1e-12  # torch.nn.functional.normalize default eps (clamps the L2 norm)


def _vmem_budget_bytes():
    """Generation-aware VMEM sizing: (tile-budget bytes, scoped vmem_limit_bytes)."""
    cap = 64 * 1024 * 1024  # conservative default: v7x physical VMEM per TC
    try:
        info = pltpu.get_tpu_info()
        cap = int(getattr(info, "vmem_capacity_bytes", cap))
    except Exception:
        pass
    if cap >= 96 * 1024 * 1024:  # v5e / v6e: 128 MiB physical
        return 96 * 1024 * 1024, 104 * 1024 * 1024
    return 40 * 1024 * 1024, 48 * 1024 * 1024  # v7x: 64 MiB physical


def _pick_row_tile(rows, dim, itemsize, row_tile, budget, min_steps=4):
    """Pick a row-tile: sublane aligned, VMEM-bounded, >= min_steps grid steps."""
    align = 16 if itemsize < 4 else 8  # bf16/fp8 pack 2/4 rows per sublane
    if row_tile is None:
        # HBM-bound kernel: big tiles amortize the ~0.35 us per-step overhead.
        row_tile = 2048 if itemsize < 4 else 1536
    # Double-buffered in + out tiles at the I/O dtype plus the short-lived f32
    # output-expression temporary (x_ref is re-read, so no long-lived f32 copy).
    bytes_per_row = dim * (4 * itemsize + 4)
    max_rows_by_vmem = max(align, (budget // bytes_per_row) // align * align)
    rt = min(row_tile, max_rows_by_vmem, pl.cdiv(rows, align) * align)
    # Keep >= min_steps grid steps when rows permit so DMA/compute/writeback
    # pipeline and the row grid can shard across TensorCores (v7x megacore).
    if rows > min_steps * align:
        rt = min(rt, pl.cdiv(pl.cdiv(rows, min_steps), align) * align)
    rt = max(align, (rt // align) * align)
    return rt


# ---------------------------------------------------------------------------
# Kernels
# ---------------------------------------------------------------------------

def _rmsnorm_kernel(g_ref, x_ref, o_ref, *, scale):
    # g_ref: (1,) scalar parameter in SMEM.
    # x_ref / o_ref: (row_tile, dim) VMEM tiles; dim is the normalized axis.
    xf = x_ref[...].astype(jnp.float32)
    ss = jnp.sum(xf * xf, axis=-1, keepdims=True)            # (rt, 1) XLU reduce

    # F.normalize semantics: x / max(||x||, eps) == x * rsqrt(max(ss, eps^2)).
    inv = lax.rsqrt(jnp.maximum(ss, _EPS * _EPS))             # EUP rsqrt (free slot)

    # Fold sqrt(dim) and the learnable scalar g into the tiny (rt, 1) column.
    mult = inv * (g_ref[0].astype(jnp.float32) * scale)

    # Re-read x_ref for the output expression: cheap VMEM reload (kernel is
    # DMA-bound), avoids keeping the upcast f32 tile live across the reduce.
    o_ref[...] = (x_ref[...].astype(jnp.float32) * mult).astype(o_ref.dtype)


def _rmsnorm_modulate_kernel(g_ref, x_ref, sc_ref, sh_ref, o_ref, *, scale):
    # g_ref: (1,) SMEM scalar.
    # x_ref / o_ref: (1, token_tile, dim) VMEM tiles.
    # sc_ref / sh_ref: (1, 1, dim) per-batch adaLN scale / shift tiles.
    xf = x_ref[0].astype(jnp.float32)                         # (tt, dim)
    ss = jnp.sum(xf * xf, axis=-1, keepdims=True)             # (tt, 1)
    inv = lax.rsqrt(jnp.maximum(ss, _EPS * _EPS))
    mult = inv * (g_ref[0].astype(jnp.float32) * scale)       # (tt, 1)

    sc = 1.0 + sc_ref[0].astype(jnp.float32)                  # (1, dim)
    sh = sh_ref[0].astype(jnp.float32)                        # (1, dim)

    y = (x_ref[0].astype(jnp.float32) * mult) * sc + sh       # fused modulate
    o_ref[0] = y.astype(o_ref.dtype)


# ---------------------------------------------------------------------------
# Wrappers
# ---------------------------------------------------------------------------

def rmsnorm(x, g, *, row_tile=None):
    """DiT RMSNorm: F.normalize(x, dim=-1) * sqrt(dim) * g.

    x: (..., dim); g: learnable scalar of shape (1,). Returns same shape/dtype.
    """
    if g.shape != (1,):
        raise ValueError(f"g must be a scalar parameter of shape (1,), got {g.shape}")
    orig_shape = x.shape
    dim = orig_shape[-1]
    scale = float(dim) ** 0.5

    x2d = x.reshape(-1, dim)
    rows = x2d.shape[0]

    budget, vmem_limit = _vmem_budget_bytes()
    rt = _pick_row_tile(rows, dim, x.dtype.itemsize, row_tile, budget)
    grid = (pl.cdiv(rows, rt),)  # ragged tail handled by Pallas masking

    out = pl.pallas_call(
        functools.partial(_rmsnorm_kernel, scale=scale),
        out_shape=jax.ShapeDtypeStruct((rows, dim), x.dtype),
        grid=grid,
        in_specs=[
            pl.BlockSpec(memory_space=pltpu.MemorySpace.SMEM),   # g (scalar param)
            pl.BlockSpec((rt, dim), lambda i: (i, 0)),           # x row tile
        ],
        out_specs=pl.BlockSpec((rt, dim), lambda i: (i, 0)),
        compiler_params=pltpu.CompilerParams(
            dimension_semantics=("parallel",),   # row grid shards across TCs (v7x)
            vmem_limit_bytes=vmem_limit,
        ),
    )(g, x2d)

    return out.reshape(orig_shape)


def rmsnorm_modulate(x, g, scale_mod, shift_mod, *, token_tile=None):
    """Fused DiT adaLN pre-norm: modulate(RMSNorm(x), scale_mod, shift_mod).

    x: (B, T, dim); g: (1,); scale_mod / shift_mod: (B, dim).
    Returns RMSNorm(x) * (1 + scale_mod[:, None, :]) + shift_mod[:, None, :].
    """
    if g.shape != (1,):
        raise ValueError(f"g must be a scalar parameter of shape (1,), got {g.shape}")
    B, T, dim = x.shape
    if scale_mod.shape != (B, dim) or shift_mod.shape != (B, dim):
        raise ValueError("scale_mod / shift_mod must have shape (B, dim)")
    scale = float(dim) ** 0.5

    budget, vmem_limit = _vmem_budget_bytes()
    # Aim for >= 4 total grid steps (B batch steps x token steps).
    min_steps_t = max(1, -(-4 // B))
    tt = _pick_row_tile(T, dim, x.dtype.itemsize, token_tile, budget,
                        min_steps=min_steps_t)
    grid = (B, pl.cdiv(T, tt))

    sc3 = scale_mod.reshape(B, 1, dim)
    sh3 = shift_mod.reshape(B, 1, dim)

    out = pl.pallas_call(
        functools.partial(_rmsnorm_modulate_kernel, scale=scale),
        out_shape=jax.ShapeDtypeStruct((B, T, dim), x.dtype),
        grid=grid,
        in_specs=[
            pl.BlockSpec(memory_space=pltpu.MemorySpace.SMEM),      # g
            pl.BlockSpec((1, tt, dim), lambda b, i: (b, i, 0)),     # x token tile
            pl.BlockSpec((1, 1, dim), lambda b, i: (b, 0, 0)),      # adaLN scale
            pl.BlockSpec((1, 1, dim), lambda b, i: (b, 0, 0)),      # adaLN shift
        ],
        out_specs=pl.BlockSpec((1, tt, dim), lambda b, i: (b, i, 0)),
        compiler_params=pltpu.CompilerParams(
            dimension_semantics=("parallel", "parallel"),
            vmem_limit_bytes=vmem_limit,
        ),
    )(g, x, sc3, sh3)

    return out


# ---------------------------------------------------------------------------
# Pure-JAX references (mirror the PyTorch forward)
# ---------------------------------------------------------------------------

def rmsnorm_ref(x, g):
    dim = x.shape[-1]
    scale = float(dim) ** 0.5
    xf = x.astype(jnp.float32)
    norm = jnp.maximum(jnp.linalg.norm(xf, axis=-1, keepdims=True), _EPS)
    return ((xf / norm) * scale * g[0].astype(jnp.float32)).astype(x.dtype)


def rmsnorm_modulate_ref(x, g, scale_mod, shift_mod):
    y = rmsnorm_ref(x, g).astype(jnp.float32)
    out = (y * (1.0 + scale_mod[:, None, :].astype(jnp.float32))
           + shift_mod[:, None, :].astype(jnp.float32))
    return out.astype(x.dtype)


if __name__ == "__main__":
    key = jax.random.PRNGKey(0)
    k1, k2, k3, k4, k5, k6, k7 = jax.random.split(key, 7)

    # Deterministic parameter init: nn.Parameter(torch.ones(1))
    g = jnp.ones((1,), dtype=jnp.float32)

    # Case 1: standalone RMSNorm, f32, small lane-dense hidden dim.
    x1 = jax.random.normal(k1, (2, 64, 256), dtype=jnp.float32)
    o1 = jax.block_until_ready(rmsnorm(x1, g))
    r1 = rmsnorm_ref(x1, g)
    assert o1.shape == x1.shape and o1.dtype == x1.dtype
    assert jnp.allclose(o1, r1, atol=2e-5, rtol=1e-5), "f32 (dim=256) mismatch"

    # Case 2: the real MFDiT hidden dim (1152 = 9*128) with a ragged row count
    # (exercises the masked-tail path and multi-step pipelining).
    x2 = jax.random.normal(k2, (2, 20, 1152), dtype=jnp.float32)
    o2 = jax.block_until_ready(rmsnorm(x2, g))
    r2 = rmsnorm_ref(x2, g)
    assert o2.shape == x2.shape and o2.dtype == x2.dtype
    assert jnp.allclose(o2, r2, atol=2e-5, rtol=1e-5), "f32 (dim=1152) mismatch"

    # Case 3: bf16 inputs (f32 compute inside the kernel), looser tolerance.
    x3 = jax.random.normal(k3, (2, 64, 256), dtype=jnp.bfloat16)
    o3 = jax.block_until_ready(rmsnorm(x3, g))
    r3 = rmsnorm_ref(x3, g)
    assert o3.shape == x3.shape and o3.dtype == x3.dtype
    assert jnp.allclose(o3.astype(jnp.float32), r3.astype(jnp.float32),
                        atol=2e-2, rtol=2e-2), "bf16 mismatch"

    # Case 4: fused RMSNorm + adaLN modulate (the DiTBlock / FinalLayer path), f32.
    x4 = jax.random.normal(k4, (2, 64, 256), dtype=jnp.float32)
    sc4 = 0.1 * jax.random.normal(k5, (2, 256), dtype=jnp.float32)
    sh4 = 0.1 * jax.random.normal(k6, (2, 256), dtype=jnp.float32)
    o4 = jax.block_until_ready(rmsnorm_modulate(x4, g, sc4, sh4))
    r4 = rmsnorm_modulate_ref(x4, g, sc4, sh4)
    assert o4.shape == x4.shape and o4.dtype == x4.dtype
    assert jnp.allclose(o4, r4, atol=5e-5, rtol=1e-5), "fused f32 mismatch"

    # Case 5: fused path in bf16.
    x5 = x4.astype(jnp.bfloat16)
    sc5 = sc4.astype(jnp.bfloat16)
    sh5 = sh4.astype(jnp.bfloat16)
    o5 = jax.block_until_ready(rmsnorm_modulate(x5, g, sc5, sh5))
    r5 = rmsnorm_modulate_ref(x5, g, sc5, sh5)
    assert o5.shape == x5.shape and o5.dtype == x5.dtype
    assert jnp.allclose(o5.astype(jnp.float32), r5.astype(jnp.float32),
                        atol=3e-2, rtol=3e-2), "fused bf16 mismatch"

    print("KERNEL_OK")
</pallas_src>

<mosaic_0001>
module attributes {stable_mosaic.version = 11 : i64} {
  func.func @_rmsnorm_kernel(%arg0: i32, %arg1: memref<1xf32, #tpu.memory_space<smem>>, %arg2: memref<32x256xf32, #tpu.memory_space<vmem>>, %arg3: memref<32x256xf32, #tpu.memory_space<vmem>>) attributes {dimension_semantics = [#tpu.dimension_semantics<parallel>], iteration_bounds = array<i64: 4>, scalar_prefetch = 0 : i64, scratch_operands = 0 : i64, tpu.core_type = #tpu.core_type<tc>, window_params = [{transform_indices = @transform_0, window_bounds = array<i64: 1>}, {transform_indices = @transform_1, window_bounds = array<i64: 32, 256>}, {transform_indices = @transform_2, window_bounds = array<i64: 32, 256>}]} {
    %c0 = arith.constant 0 : index
    %c0_0 = arith.constant 0 : index
    %0 = vector.load %arg2[%c0, %c0_0] : memref<32x256xf32, #tpu.memory_space<vmem>>, vector<32x256xf32>
    %1 = arith.mulf %0, %0 : vector<32x256xf32>
    %cst = arith.constant dense<0.000000e+00> : vector<32xf32>
    %2 = vector.multi_reduction <add>, %1, %cst [1] : vector<32x256xf32> to vector<32xf32>
    %3 = vector.shape_cast %2 : vector<32xf32> to vector<32x1xf32>
    %cst_1 = arith.constant 1.000000e-24 : f32
    %4 = vector.broadcast %cst_1 : f32 to vector<32x1xf32>
    %5 = arith.maximumf %3, %4 : vector<32x1xf32>
    %6 = math.rsqrt %5 : vector<32x1xf32>
    %c0_2 = arith.constant 0 : index
    %7 = memref.load %arg1[%c0_2] : memref<1xf32, #tpu.memory_space<smem>>
    %cst_3 = arith.constant 1.600000e+01 : f32
    %8 = arith.mulf %7, %cst_3 : f32
    %9 = vector.broadcast %8 : f32 to vector<32x1xf32>
    %10 = arith.mulf %6, %9 : vector<32x1xf32>
    %c0_4 = arith.constant 0 : index
    %c0_5 = arith.constant 0 : index
    %11 = vector.load %arg2[%c0_4, %c0_5] : memref<32x256xf32, #tpu.memory_space<vmem>>, vector<32x256xf32>
    %12 = vector.broadcast %10 : vector<32x1xf32> to vector<32x256xf32>
    %13 = arith.mulf %11, %12 : vector<32x256xf32>
    %c0_6 = arith.constant 0 : index
    %c0_7 = arith.constant 0 : index
    %14 = vector.load %arg3[%c0_6, %c0_7] : memref<32x256xf32, #tpu.memory_space<vmem>>, vector<32x256xf32>
    tpu.vector_store %arg3[%c0_6, %c0_7], %13 {strides = array<i32>} : memref<32x256xf32, #tpu.memory_space<vmem>>, vector<32x256xf32>,
    return
  }
  func.func @transform_0(%arg0: i32) -> i32 {
    %c0_i32 = arith.constant 0 : i32
    %c0_i32_0 = arith.constant 0 : i32
    return %c0_i32 : i32
  }
  func.func @transform_1(%arg0: i32) -> (i32, i32) {
    %c0_i32 = arith.constant 0 : i32
    %c0_i32_0 = arith.constant 0 : i32
    return %arg0, %c0_i32 : i32, i32
  }
  func.func @transform_2(%arg0: i32) -> (i32, i32) {
    %c0_i32 = arith.constant 0 : i32
    %c0_i32_0 = arith.constant 0 : i32
    return %arg0, %c0_i32 : i32, i32
  }
}

</mosaic_0001>

<bundles_post_ra>
// kernel: tpu_custom_call.1
= control target key start
LH: loop header
LB: loop body
LE: loop exit
PB: predicated region body
PF: predicated region fallthrough
CT: control target
= control target key end

     0   :  { %s720_s0 = inlined_call_operand.<no memory space> [shape: f32[1], index: 0, kind: input, shape index: {}]   ;;  %s721_s1 = inlined_call_operand.hbm [shape: f32[128,256], index: 1, kind: input, shape index: {}]   ;;  %s722_s2 = inlined_call_operand.hbm [shape: f32[128,256], index: 2, kind: output, shape index: {}]  }
   0x1   :  { %7 = sst [smem:[#allocation2]] %s720_s0 }
   0x2   :  { %8 = vsyncpa [#allocation4], 0 }
   0x3   :  { %10 = vsyncpa [#allocation4 + $0x1], 0 }
   0x4   :  { %11 = vsyncpa [#allocation5], 0 }
   0x5   :  { %13 = vsyncpa [#allocation5 + $0x1], 0  ;;  %s551_s11 = smov 0   ;;  %s553_s12 = smov 0  }
   0x6   :  { %s555_s13 = smov 0   ;;  %s557_s14 = smov 0  }
   0x7 LB: > { %s572_s0 = sadd.s32 4294967295, %s527_s14   ;;  %s353_s15 = sadd.s32 4294967294, %s527_s14   ;;  %s527_s14 = sphi %s557_s14, %s731_s14   ;;  %s523_s13 = sphi %s555_s13, %s730_s13   ;;  %s519_s12 = sphi %s553_s12, %s729_s12   ;;  %s515_s11 = sphi %s551_s11, %s728_s11  }
   0x8   : > { %s576_s16 = sadd.s32 1, %s527_s14   ;;  %s47_s17 = sadd.s32 1, %s523_s13 }
   0x9   : > { %s44_s18 = ssub.s32 %s527_s14, %s576_s16  ;;  %p54_p0 = scmp.ne.s32.totalorder %s523_s13, %s519_s12 }
   0xa   : > { %p45_p1 = scmp.eq.s32.totalorder %s44_s18, 0  ;;  %p55_p2 = scmp.eq.s32.totalorder %s527_s14, 0 }
   0xb   : > { %p60_p3 = scmp.ne.s32.totalorder %s519_s12, %s515_s11  ;;  %p61_p4 = scmp.eq.s32.totalorder %s572_s0, 0 }
   0xc   : > { %s588_s19 = scalar_select %p45_p1, %s523_s13, %s47_s17  }
   0xd   : > { %p590_p5 = por %p55_p2, %p54_p0  ;;  %p594_p6 = por %p61_p4, %p60_p3 }
   0xe   : > { %p84_p7 = scmp.eq.s32.totalorder %s572_s0, 3  ;;  %p90_p8 = scmp.eq.s32.totalorder %s353_s15, 3 }
   0xf   : > { %p385_p9 = scmp.lt.s32.totalorder %s527_s14, 4  ;;  %s113_s24 = sand.u32 1, %s523_s13  }
  0x10   : > { %p600_p10 = por %p84_p7, %p54_p0  ;;  %p604_p11 = por %p90_p8, %p60_p3 }
  0x11   : > { %s370_s25 = sshll.u32 %s527_s14, 6  ;;  %s356_s26 = sshll.u32 %s113_s24, 6 }
  0x12   : > { %s123_s29 = scalar_lea.hbm %s721_s1, %s370_s25  ;;  %s117_s3 = scalar_lea.vmem [#allocation3], %s356_s26 }
  0x13   : > { %s124_s30 = sshll.u32 %s123_s29, 4  ;;  %s126_s4 = sshll.u32 %s117_s3, 4  ;;  %s125_s30 = int_to_ptr.hbm [resolvable:$true] %s124_s30  ;;  %s127_s4 = int_to_ptr.vmem [resolvable:$true] %s126_s4 }
  0x14   : > { %p615_p12 = pnand %p385_p9, %p590_p5  ;;  %p360_p13 = scmp.ge.s32.totalorder %s527_s14, 1 }
  0x15   : > { %p134_p0 = scmp.lt.s32.totalorder %s527_s14, 5  ;;  %s114_s6 = scalar_lea.sflag [#allocation4], %s113_s24 }
  0x16   : > { %s431_s7 = sshra.s32 %s125_s30, 4  ;;  %p435_p2 = pneg %p615_p12  ;;  %s432_s7 = int_to_ptr.hbm [resolvable:$true] %s431_s7 }
  0x17   : > { %s433_s8 = scalar_lea.hbm %s432_s7, 64  ;;  %s438_s15 = scalar_lea.hbm %s721_s1, 256 }
  0x18   : > { %p434_p1 = scmp.ne.s32.totalorder %s432_s7, %s433_s8  ;;  %p439_p5 = scmp.lt.s32.totalorder %s432_s7, %s721_s1 }
  0x19   : > { %p440_p7 = scmp.lt.s32.totalorder %s438_s15, %s433_s8 }
  0x1a   : > { %p436_p3 = pnand %p435_p2, %p434_p1 }
  0x1b   : > { %p441_p8 = por %p440_p7, %p439_p5 }
  0x1c   : > { %p437_p4 = pneg %p436_p3 }
  0x1e   : > { %p442_p9 = pnand %p441_p8, %p437_p4 }
  0x20   : > { %445 = shalt.err (!%p442_p9)
}
  0x21   : > { %s529_s20 = smov 256   ;;  %s530_s24 = smov 16  }
  0x22   : > { %380 = dma.hbm_to_vmem [thread:$0]  (!%p615_p12), %s125_s30, 1024, %s127_s4, %s114_s6, %s529_s20, %s529_s20, %s530_s24  }
  0x23   : > { %p135_p1 = pnand %p360_p13, %p134_p0 }
  0x24   : > { %s636_s25 = sand.u32 (!%p135_p1), 1, %s519_s12  }
  0x25   : > { %138 = sbr.rel (%p135_p1) target bundleno = 203 (0xcb), region = 28  ;;  %s361_s26 = sshll.u32 (!%p135_p1), %s636_s25, 6 }
  0x26   : > { %s141_s27 = scalar_lea.sflag (!%p135_p1), [#allocation4], %s636_s25  ;;  %s144_s28 = scalar_lea.vmem (!%p135_p1), [#allocation3], %s361_s26 }
  0x2a   : > { %506 = dma.done.wait (%p594_p6), %s141_s27, 1024  }
  0x2b   : > { %508 = vsyncadd (%p594_p6), %s141_s27, 4294966272  ;;  %v646_v0 = vld [vmem:[%s144_s28 + $0x20] sm:$0xff]  ;;  %v648_v1 = vld [vmem:[%s144_s28 + $0x28] sm:$0xff]  ;;  %s240_s21 = sld [smem:[#allocation2]]  ;;  %s372_s30 = sshll.u32 %s572_s0, 6 }
  0x2c   : > { %v650_v2 = vld [vmem:[%s144_s28] sm:$0xff]  ;;  %v180_v3 = vmul.f32 %v646_v0, %v646_v0  ;;  %v181_v4 = vmul.f32 %v648_v1, %v648_v1  ;;  %v656_v5 = vld [vmem:[%s144_s28 + $0x8] sm:$0xff]  ;;  %v662_v8 = vld [vmem:[%s144_s28 + $0x30] sm:$0xff]  ;;  %s165_s3 = scalar_lea.vmem [#allocation6], %s361_s26  ;;  %s276_s6 = scalar_lea.hbm %s722_s2, %s372_s30 }
  0x2d   : > { %v176_v6 = vmul.f32 %v650_v2, %v650_v2  ;;  %v177_v7 = vmul.f32 %v656_v5, %v656_v5  ;;  %v664_v9 = vld [vmem:[%s144_s28 + $0x38] sm:$0xff]  ;;  %v666_v11 = vld [vmem:[%s144_s28 + $0x10] sm:$0xff]  ;;  %v182_v14 = vmul.f32 %v662_v8, %v662_v8  ;;  %s277_s0 = sshll.u32 %s165_s3, 4  ;;  %s279_s7 = sshll.u32 %s276_s6, 4  ;;  %s278_s0 = int_to_ptr.vmem [resolvable:$true] %s277_s0  ;;  %s280_s7 = int_to_ptr.hbm [resolvable:$true] %s279_s7 }
  0x2e   : > { %v190_v10 = vadd.f32 %v181_v4, %v180_v3  ;;  %v668_v12 = vld [vmem:[%s144_s28 + $0x18] sm:$0xff]  ;;  %v183_v15 = vmul.f32 %v664_v9, %v664_v9  ;;  %v178_v16 = vmul.f32 %v666_v11, %v666_v11  ;;  %s264_s8 = scalar_lea.sflag [#allocation5], %s636_s25  ;;  %s475_s9 = sshra.s32 %s280_s7, 4  ;;  %s476_s9 = int_to_ptr.hbm [resolvable:$true] %s475_s9 }
  0x2f   : > { %v184_v13 = vadd.f32 %v177_v7, %v176_v6  ;;  %v179_v17 = vmul.f32 %v668_v12, %v668_v12  ;;  %s477_s10 = scalar_lea.hbm %s476_s9, 64  ;;  %s481_s18 = scalar_lea.hbm %s722_s2, 256 }
  0x30   : > { %191 = vadd.xlane.f32.xlu1 %v190_v10  ;;  %v193_v18 = vadd.f32 %v183_v15, %v182_v14  ;;  %p478_p6 = scmp.ne.s32.totalorder %s476_s9, %s477_s10  ;;  %p482_p0 = scmp.lt.s32.totalorder %s476_s9, %s722_s2 }
  0x31   : > { %185 = vadd.xlane.f32.xlu0 %v184_v13  ;;  %v187_v19 = vadd.f32 %v179_v17, %v178_v16  ;;  %s241_s29 = smul.f32 16.0, %s240_s21  ;;  %p483_p2 = scmp.lt.s32.totalorder %s481_s18, %s477_s10 }
  0x32   : > { %p479_p12 = pnand %p478_p6, %p600_p10 }
  0x33   : > { %v242_v40 = vstv %s241_s29  ;;  %p484_p3 = por %p483_p2, %p482_p0 }
  0x34   : > { %p480_p13 = pneg %p479_p12 }
  0x36   : > { %p485_p4 = pnand %p484_p3, %p480_p13 }
  0x38   : > { %194 = vadd.xlane.f32.xlu1 %v193_v18 }
  0x39   : > { %188 = vadd.xlane.f32.xlu0 %v187_v19 }
  0xa3   : > { %v192_v20 = vpop.xlane.xlu1 %191 }
  0xa4   : > { %v198_v21 = vmax.f32 %v192_v20, 1e-24  ;;  %v186_v22 = vpop.xlane.xlu0 %185 }
  0xa5   : > { %v196_v23 = vmax.f32 %v186_v22, 1e-24 }
  0xa6   : > { %423 = vrsqrt.f32 %v198_v21  ;;  %vm226_vm2 = vweird.f32 %v198_v21 }
  0xa7   : > { %425 = vrsqrt.f32 %v196_v23  ;;  %vm206_vm4 = vweird.f32 %v196_v23 }
  0xab   : > { %v195_v24 = vpop.xlane.xlu1 %194 }
  0xac   : > { %v424_v25 = vpop.eup %423  ;;  %v199_v26 = vmax.f32 %v195_v24, 1e-24  ;;  %v189_v27 = vpop.xlane.xlu0 %188 }
  0xad   : > { %v426_v28 = vpop.eup %425  ;;  %v221_v29 = vmul.f32 %v424_v25, %v198_v21  ;;  %v197_v30 = vmax.f32 %v189_v27, 1e-24  ;;  %vm227_vm0 = vweird.f32 %v424_v25 }
  0xae   : > { %v201_v31 = vmul.f32 %v426_v28, %v196_v23  ;;  %427 = vrsqrt.f32 %v199_v26  ;;  %vm207_vm1 = vweird.f32 %v426_v28  ;;  %vm228_vm3 = vmor %vm226_vm2, %vm227_vm0  ;;  %vm236_vm8 = vweird.f32 %v199_v26 }
  0xaf   : > { %v222_v32 = vmul.f32 %v424_v25, %v221_v29  ;;  %429 = vrsqrt.f32 %v197_v30  ;;  %vm208_vm5 = vmor %vm206_vm4, %vm207_vm1  ;;  %vm216_vm10 = vweird.f32 %v197_v30 }
  0xb0   : > { %v202_v33 = vmul.f32 %v426_v28, %v201_v31 }
  0xb1   : > { %v223_v34 = vmul.f32 0.5, %v222_v32 }
  0xb2   : > { %v203_v35 = vmul.f32 0.5, %v202_v33 }
  0xb3   : > { %v224_v36 = vsub.f32 1.5, %v223_v34 }
  0xb4   : > { %v428_v37 = vpop.eup %427  ;;  %v204_v38 = vsub.f32 1.5, %v203_v35 }
  0xb5   : > { %v430_v39 = vpop.eup %429  ;;  %v225_v41 = vmul.f32 %v424_v25, %v224_v36  ;;  %v231_v42 = vmul.f32 %v428_v37, %v199_v26  ;;  %vm237_vm6 = vweird.f32 %v428_v37 }
  0xb6   : > { %v205_v43 = vmul.f32 %v426_v28, %v204_v38  ;;  %v211_v44 = vmul.f32 %v430_v39, %v197_v30  ;;  %vm217_vm7 = vweird.f32 %v430_v39  ;;  %vm238_vm9 = vmor %vm236_vm8, %vm237_vm6 }
  0xb7   : > { %v229_v45 = vsel %vm228_vm3, %v424_v25, %v225_v41  ;;  %v232_v46 = vmul.f32 %v428_v37, %v231_v42  ;;  %vm218_vm11 = vmor %vm216_vm10, %vm217_vm7 }
  0xb8   : > { %v245_v47 = vmul.f32 %v242_v40, %v229_v45  ;;  %v209_v48 = vsel %vm208_vm5, %v426_v28, %v205_v43  ;;  %v212_v49 = vmul.f32 %v430_v39, %v211_v44 }
  0xb9   : > { %v243_v50 = vmul.f32 %v242_v40, %v209_v48  ;;  %v233_v51 = vmul.f32 0.5, %v232_v46 }
  0xba   : > { %v251_v52 = vmul.f32 %v245_v47, %v646_v0  ;;  %v252_v53 = vmul.f32 %v245_v47, %v648_v1  ;;  %v213_v54 = vmul.f32 0.5, %v212_v49 }
  0xbb   : > { %v247_v55 = vmul.f32 %v243_v50, %v650_v2  ;;  %v248_v56 = vmul.f32 %v243_v50, %v656_v5  ;;  %v234_v57 = vsub.f32 1.5, %v233_v51 }
  0xbc   : > { %259 = vst [vmem:[%s165_s3 + $0x20] sm:$0xff] %v251_v52  ;;  %v214_v58 = vsub.f32 1.5, %v213_v54 }
  0xbd   : > { %260 = vst [vmem:[%s165_s3 + $0x28] sm:$0xff] %v252_v53  ;;  %v235_v59 = vmul.f32 %v428_v37, %v234_v57 }
  0xbe   : > { %255 = vst [vmem:[%s165_s3] sm:$0xff] %v247_v55  ;;  %v215_v60 = vmul.f32 %v430_v39, %v214_v58 }
  0xbf   : > { %256 = vst [vmem:[%s165_s3 + $0x8] sm:$0xff] %v248_v56  ;;  %v239_v61 = vsel %vm238_vm9, %v428_v37, %v235_v59 }
  0xc0   : > { %v246_v62 = vmul.f32 %v242_v40, %v239_v61  ;;  %v219_v63 = vsel %vm218_vm11, %v430_v39, %v215_v60 }
  0xc1   : > { %v244_v0 = vmul.f32 %v242_v40, %v219_v63 }
  0xc2   : > { %v253_v1 = vmul.f32 %v246_v62, %v662_v8  ;;  %v254_v2 = vmul.f32 %v246_v62, %v664_v9 }
  0xc3   : > { %v249_v3 = vmul.f32 %v244_v0, %v666_v11  ;;  %v250_v4 = vmul.f32 %v244_v0, %v668_v12 }
  0xc4   : > { %261 = vst [vmem:[%s165_s3 + $0x30] sm:$0xff] %v253_v1 }
  0xc5   : > { %262 = vst [vmem:[%s165_s3 + $0x38] sm:$0xff] %v254_v2 }
  0xc6   : > { %257 = vst [vmem:[%s165_s3 + $0x10] sm:$0xff] %v249_v3 }
  0xc7   : > { %258 = vst [vmem:[%s165_s3 + $0x18] sm:$0xff] %v250_v4 }
  0xc8   : > { %488 = shalt.err (!%p485_p4)
}
  0xc9   : > { %s531_s25 = smov 256   ;;  %s532_s26 = smov 16  }
  0xca   : > { %375 = dma.vmem_to_hbm [thread:$0]  (%p600_p10), %s278_s0, 1024, %s280_s7, %s264_s8, %s531_s25, %s531_s25, %s532_s26  }
  0xcb PF: > { %p386_p5 = scmp.ge.s32.totalorder %s527_s14, 2  ;;  %s294_s27 = sand.u32 1, %s515_s11  }
  0xcc   : > { %s295_s28 = scalar_lea.sflag [#allocation5], %s294_s27 }
  0xcd   : > { %p382_p7 = pnand %p386_p5, %p604_p11 }
  0xcf   : > { %p383_p8 = pneg %p382_p7 }
  0xd1   : > { %510 = dma.done.wait (%p383_p8), %s295_s28, 1024  }
  0xd2   : > { %512 = vsyncadd (%p383_p8), %s295_s28, 4294966272  ;;  %p16_p9 = scmp.ge.s32.totalorder %s576_s16, 6   ;;  %s728_s11 = smov %s519_s12 }
  0xd3   : > { %s729_s12 = smov %s523_s13  ;;  %s730_s13 = smov %s588_s19 }
  0xd4   : > { %s731_s14 = smov %s576_s16  ;;  %18 = sbr.rel (!%p16_p9) target bundleno = 7 (0x7), region = 73 }
  0xd9   :  { %301 = vsyncpa [#allocation4], 1 }
  0xda   :  { %303 = vsyncpa [#allocation4 + $0x1], 1 }
  0xdb   :  { %304 = vsyncpa [#allocation5], 1 }
  0xdc   :  { %306 = vsyncpa [#allocation5 + $0x1], 1 }

</bundles_post_ra>
